<compile_context>
chip_gen: v6e
topology: v6e:2x2x1
jax: 0.10.0
libtpu: 0.0.40
codegen_flags: <defaults>
</compile_context>

<pallas_src>
import jax
import jax.numpy as jnp
from jax import lax
from jax.experimental import pallas as pl
from jax.experimental.pallas import tpu as pltpu

_LANE = 128


def _round_up(x, m):
    return (x + m - 1) // m * m


def _pick_batch_tile(B, max_tile_b):
    assert max_tile_b % 16 == 0, "max_tile_b must be a multiple of 16"
    rows = _round_up(B, 16)
    tb = min(max_tile_b, rows)
    # v7x megacore: prefer >= 2 grid steps so ("parallel",) shards the batch
    # across both TensorCores, as long as each step keeps >= 512 rows so the
    # ~0.35us per-step overhead stays amortized.  Neutral on v5e/v6e (1 TC).
    if rows // 2 >= 512:
        tb = min(tb, _round_up(rows // 2, 16))
    assert tb % 16 == 0
    return tb


def _mlp_kernel(x_ref, w1_ref, b1_ref, w2_ref, b2_ref, w3_ref, b3_ref, o_ref):
    # x streams in as f32 and is cast to bf16 on the VPU (huge slack) right
    # before the MXU -> no separate wrapper-side convert pass over x in HBM.
    x = x_ref[...].astype(jnp.bfloat16)

    # fc1 + ReLU : bf16 MXU matmul, f32 accumulation.
    h1 = jnp.dot(x, w1_ref[...], preferred_element_type=jnp.float32)
    h1 = jnp.maximum(h1 + b1_ref[...], 0.0)

    # fc2 + ReLU.
    h2 = jnp.dot(h1.astype(w2_ref.dtype), w2_ref[...],
                 preferred_element_type=jnp.float32)
    h2 = jnp.maximum(h2 + b2_ref[...], 0.0)

    # fc3 (output width 1), lane-packed: contract the H2 axis of the prepared
    # w3 slab (8, H2p; row 0 = w3^T, rows 1..7 = 0) against the H2 axis of h2
    # (tb, H2p) -> (8, tb).  Row 0 is the real result, already laid out along
    # lanes, so the store is a dense (1, tb) row instead of a 128x-broadcast
    # slab (HBM writeback drops ~128x).
    out8 = lax.dot_general(
        w3_ref[...], h2,
        dimension_numbers=(((1,), (1,)), ((), ())),
        preferred_element_type=jnp.float32)
    o_ref[...] = out8[0:1, :] + b3_ref[0, 0]


def prepare_params(params):
    """One-time pad/cast of the weights (hoisted off the per-call hot path).

    Weights are stored (in, out); biases (1, out).  Hidden dims are zero-padded
    to lane width (128): padded hidden units stay exactly 0 through ReLU and
    contribute nothing downstream, so the math is unchanged.
    """
    w1, b1, w2, b2, w3, b3 = params
    D, H = w1.shape
    H2 = w2.shape[1]
    Dp, Hp, H2p = (_round_up(d, _LANE) for d in (D, H, H2))

    w1p = jnp.pad(w1, ((0, Dp - D), (0, Hp - H))).astype(jnp.bfloat16)
    b1p = jnp.pad(b1, ((0, 0), (0, Hp - H))).astype(jnp.float32)
    w2p = jnp.pad(w2, ((0, Hp - H), (0, H2p - H2))).astype(jnp.bfloat16)
    b2p = jnp.pad(b2, ((0, 0), (0, H2p - H2))).astype(jnp.float32)
    # fc3 weight as an (8, H2p) f32 slab: row 0 = w3^T, rows 1..7 = 0 (keeps
    # the in-kernel dot_general LHS at the native 8-sublane height).
    w3p = jnp.pad(w3.T, ((0, 7), (0, H2p - H2))).astype(jnp.float32)
    b3s = b3.reshape(1, 1).astype(jnp.float32)
    return (w1p, b1p, w2p, b2p, w3p, b3s)


def mlp_out1_forward(x, prepared, *, max_tile_b=1024):
    """x: (B, C, F, T) float32; prepared = prepare_params(params).  -> (B, 1) f32."""
    w1p, b1p, w2p, b2p, w3p, b3s = prepared
    B = x.shape[0]
    x2d = x.reshape(B, -1)                     # same as torch .view(batch, -1)
    D = x2d.shape[1]
    Dp, Hp = w1p.shape
    H2p = w2p.shape[1]

    tb = _pick_batch_tile(B, max_tile_b)
    Bp = _round_up(B, tb)                      # multiple of tb by construction
    grid_b = Bp // tb

    # x stays f32 (cast to bf16 inside the kernel); pad only what layout needs
    # (D=256 is already lane-aligned here, so usually just the batch dim).
    xp = x2d
    if Bp != B or Dp != D:
        xp = jnp.pad(x2d, ((0, Bp - B), (0, Dp - D)))

    # Advisory cost for XLA's scheduler around the custom call.
    flops = 2 * Bp * (Dp * Hp + Hp * H2p + 8 * H2p)
    bytes_accessed = (Bp * Dp * 4 + Dp * Hp * 2 + Hp * H2p * 2
                      + (Hp + H2p) * 4 + 8 * H2p * 4 + Bp * 4)
    cost = pl.CostEstimate(flops=int(flops), transcendentals=0,
                           bytes_accessed=int(bytes_accessed))

    # Explicit VMEM budget: double-buffered x tile + single-buffered weights +
    # out row + live intermediates, with 2x margin.
    vmem_need = (2 * tb * Dp * 4
                 + Dp * Hp * 2 + Hp * H2p * 2 + 8 * H2p * 4 + (Hp + H2p) * 4
                 + 2 * tb * 4
                 + 2 * tb * (Hp + H2p) * 4)
    vmem_limit = int(max(2 * vmem_need, 8 * 2 ** 20))

    # Weights never change block index -> single-buffer them (pure VMEM saving).
    resident = lambda shape: pl.BlockSpec(shape, lambda i: (0, 0),
                                          pipeline_mode=pl.Buffered(1))

    out_rows = pl.pallas_call(
        _mlp_kernel,
        out_shape=jax.ShapeDtypeStruct((grid_b, tb), jnp.float32),
        grid=(grid_b,),
        in_specs=[
            pl.BlockSpec((tb, Dp), lambda i: (i, 0)),            # x: streamed per batch tile (f32)
            resident((Dp, Hp)),                                  # w1 (bf16, VMEM-resident)
            resident((1, Hp)),                                   # b1
            resident((Hp, H2p)),                                 # w2
            resident((1, H2p)),                                  # b2
            resident((8, H2p)),                                  # w3 slab (f32)
            pl.BlockSpec(memory_space=pltpu.MemorySpace.SMEM),   # b3 scalar
        ],
        out_specs=pl.BlockSpec((1, tb), lambda i: (i, 0)),       # lane-packed rows
        compiler_params=pltpu.CompilerParams(
            dimension_semantics=("parallel",),   # shard batch across v7x's 2 TCs
            vmem_limit_bytes=vmem_limit,
        ),
        cost_estimate=cost,
    )(xp, w1p, b1p, w2p, b2p, w3p, b3s)

    return out_rows.reshape(Bp, 1)[:B]


def init_params(key, input_dim, hidden_dim):
    """Deterministic init mirroring nn.Linear (weights kept as (in, out))."""
    h2 = hidden_dim // 2
    ks = jax.random.split(key, 6)

    def lin(kw, kb, fan_in, fan_out):
        bound = 1.0 / jnp.sqrt(fan_in)
        w = jax.random.uniform(kw, (fan_in, fan_out), jnp.float32, -bound, bound)
        b = jax.random.uniform(kb, (1, fan_out), jnp.float32, -bound, bound)
        return w, b

    w1, b1 = lin(ks[0], ks[1], input_dim, hidden_dim)
    w2, b2 = lin(ks[2], ks[3], hidden_dim, h2)
    w3, b3 = lin(ks[4], ks[5], h2, 1)
    return (w1, b1, w2, b2, w3, b3)


if __name__ == "__main__":
    # Small shapes consistent with the module's forward.
    batch = 2
    num_channels = 4
    num_freq_bins = 8
    num_time_steps = 8
    hidden_dim = 32
    input_dim = num_channels * num_freq_bins * num_time_steps  # 256

    key = jax.random.PRNGKey(0)
    kx, kp = jax.random.split(key)
    x = jax.random.normal(
        kx, (batch, num_channels, num_freq_bins, num_time_steps), jnp.float32
    )
    params = init_params(kp, input_dim, hidden_dim)
    prepared = prepare_params(params)          # one-time pad/cast, off the hot path

    fwd = jax.jit(mlp_out1_forward)
    out = jax.block_until_ready(fwd(x, prepared))
    assert out.shape == (batch, 1)

    w1, b1, w2, b2, w3, b3 = params
    xr = x.reshape(batch, -1)

    # Matched-precision reference (bf16 matmul operands, f32 accumulation) — tight check.
    h1 = jnp.maximum(
        jnp.dot(xr.astype(jnp.bfloat16), w1.astype(jnp.bfloat16),
                preferred_element_type=jnp.float32) + b1, 0.0)
    h2 = jnp.maximum(
        jnp.dot(h1.astype(jnp.bfloat16), w2.astype(jnp.bfloat16),
                preferred_element_type=jnp.float32) + b2, 0.0)
    ref_bf16 = h2 @ w3 + b3
    assert jnp.allclose(out, ref_bf16, atol=1e-3, rtol=1e-3)

    # Pure f32 reference (PyTorch-equivalent math) — loose check for the
    # bf16-matmul fast path.  If strict f32 parity is required, keep fc1/fc2
    # operands f32 (the matmuls are tiny and not the bottleneck).
    rf = jnp.maximum(xr @ w1 + b1, 0.0)
    rf = jnp.maximum(rf @ w2 + b2, 0.0)
    rf = rf @ w3 + b3
    assert jnp.allclose(out, rf, atol=5e-2, rtol=5e-2)

    print("KERNEL_OK")
</pallas_src>

<mosaic_0001>
module attributes {stable_mosaic.version = 11 : i64} {
  func.func @_mlp_kernel(%arg0: i32, %arg1: memref<16x256xf32, #tpu.memory_space<vmem>>, %arg2: memref<256x128xbf16, #tpu.memory_space<vmem>>, %arg3: memref<1x128xf32, #tpu.memory_space<vmem>>, %arg4: memref<128x128xbf16, #tpu.memory_space<vmem>>, %arg5: memref<1x128xf32, #tpu.memory_space<vmem>>, %arg6: memref<8x128xf32, #tpu.memory_space<vmem>>, %arg7: memref<1x1xf32, #tpu.memory_space<smem>>, %arg8: memref<1x16xf32, #tpu.memory_space<vmem>>) attributes {dimension_semantics = [#tpu.dimension_semantics<parallel>], iteration_bounds = array<i64: 1>, scalar_prefetch = 0 : i64, scratch_operands = 0 : i64, tpu.core_type = #tpu.core_type<tc>, window_params = [{transform_indices = @transform_0, window_bounds = array<i64: 16, 256>}, {pipeline_mode = #tpu.pipeline_mode<synchronous>, transform_indices = @transform_1, window_bounds = array<i64: 256, 128>}, {pipeline_mode = #tpu.pipeline_mode<synchronous>, transform_indices = @transform_2, window_bounds = array<i64: 1, 128>}, {pipeline_mode = #tpu.pipeline_mode<synchronous>, transform_indices = @transform_3, window_bounds = array<i64: 128, 128>}, {pipeline_mode = #tpu.pipeline_mode<synchronous>, transform_indices = @transform_4, window_bounds = array<i64: 1, 128>}, {pipeline_mode = #tpu.pipeline_mode<synchronous>, transform_indices = @transform_5, window_bounds = array<i64: 8, 128>}, {transform_indices = @transform_6, window_bounds = array<i64: 1, 1>}, {transform_indices = @transform_7, window_bounds = array<i64: 1, 16>}]} {
    %c0 = arith.constant 0 : index
    %c0_0 = arith.constant 0 : index
    %0 = vector.load %arg1[%c0, %c0_0] : memref<16x256xf32, #tpu.memory_space<vmem>>, vector<16x256xf32>
    %1 = arith.truncf %0 : vector<16x256xf32> to vector<16x256xbf16>
    %c0_1 = arith.constant 0 : index
    %c0_2 = arith.constant 0 : index
    %2 = vector.load %arg2[%c0_1, %c0_2] : memref<256x128xbf16, #tpu.memory_space<vmem>>, vector<256x128xbf16>
    %cst = arith.constant dense<0.000000e+00> : vector<16x128xf32>
    %3 = tpu.matmul %1, %2, %cst {dimension_numbers = #tpu.dot_dimension_numbers<[1], [0], [0], [1], [0, 0, 1, 1], [], []>} : vector<16x256xbf16>, vector<256x128xbf16>, vector<16x128xf32> -> vector<16x128xf32>
    %c0_3 = arith.constant 0 : index
    %c0_4 = arith.constant 0 : index
    %4 = vector.load %arg3[%c0_3, %c0_4] : memref<1x128xf32, #tpu.memory_space<vmem>>, vector<1x128xf32>
    %5 = vector.broadcast %4 : vector<1x128xf32> to vector<16x128xf32>
    %6 = arith.addf %3, %5 : vector<16x128xf32>
    %cst_5 = arith.constant 0.000000e+00 : f32
    %7 = vector.broadcast %cst_5 : f32 to vector<16x128xf32>
    %8 = arith.maximumf %6, %7 : vector<16x128xf32>
    %9 = arith.truncf %8 : vector<16x128xf32> to vector<16x128xbf16>
    %c0_6 = arith.constant 0 : index
    %c0_7 = arith.constant 0 : index
    %10 = vector.load %arg4[%c0_6, %c0_7] : memref<128x128xbf16, #tpu.memory_space<vmem>>, vector<128x128xbf16>
    %cst_8 = arith.constant dense<0.000000e+00> : vector<16x128xf32>
    %11 = tpu.matmul %9, %10, %cst_8 {dimension_numbers = #tpu.dot_dimension_numbers<[1], [0], [0], [1], [0, 0, 1, 1], [], []>} : vector<16x128xbf16>, vector<128x128xbf16>, vector<16x128xf32> -> vector<16x128xf32>
    %c0_9 = arith.constant 0 : index
    %c0_10 = arith.constant 0 : index
    %12 = vector.load %arg5[%c0_9, %c0_10] : memref<1x128xf32, #tpu.memory_space<vmem>>, vector<1x128xf32>
    %13 = vector.broadcast %12 : vector<1x128xf32> to vector<16x128xf32>
    %14 = arith.addf %11, %13 : vector<16x128xf32>
    %cst_11 = arith.constant 0.000000e+00 : f32
    %15 = vector.broadcast %cst_11 : f32 to vector<16x128xf32>
    %16 = arith.maximumf %14, %15 : vector<16x128xf32>
    %c0_12 = arith.constant 0 : index
    %c0_13 = arith.constant 0 : index
    %17 = vector.load %arg6[%c0_12, %c0_13] : memref<8x128xf32, #tpu.memory_space<vmem>>, vector<8x128xf32>
    %cst_14 = arith.constant dense<0.000000e+00> : vector<8x16xf32>
    %18 = tpu.matmul %17, %16, %cst_14 {dimension_numbers = #tpu.dot_dimension_numbers<[1], [1], [0], [0], [0, 0, 1, 0], [], []>} : vector<8x128xf32>, vector<16x128xf32>, vector<8x16xf32> -> vector<8x16xf32>
    %19 = vector.extract_strided_slice %18 {offsets = [0, 0], sizes = [1, 16], strides = [1, 1]} : vector<8x16xf32> to vector<1x16xf32>
    %c0_15 = arith.constant 0 : index
    %c0_16 = arith.constant 0 : index
    %20 = memref.load %arg7[%c0_15, %c0_16] : memref<1x1xf32, #tpu.memory_space<smem>>
    %21 = vector.broadcast %20 : f32 to vector<1x16xf32>
    %22 = arith.addf %19, %21 : vector<1x16xf32>
    %c0_17 = arith.constant 0 : index
    %c0_18 = arith.constant 0 : index
    %23 = vector.load %arg8[%c0_17, %c0_18] : memref<1x16xf32, #tpu.memory_space<vmem>>, vector<1x16xf32>
    tpu.vector_store %arg8[%c0_17, %c0_18], %22 {strides = array<i32>} : memref<1x16xf32, #tpu.memory_space<vmem>>, vector<1x16xf32>,
    return
  }
  func.func @transform_0(%arg0: i32) -> (i32, i32) {
    %c0_i32 = arith.constant 0 : i32
    %c0_i32_0 = arith.constant 0 : i32
    return %arg0, %c0_i32 : i32, i32
  }
  func.func @transform_1(%arg0: i32) -> (i32, i32) {
    %c0_i32 = arith.constant 0 : i32
    %c0_i32_0 = arith.constant 0 : i32
    %c0_i32_1 = arith.constant 0 : i32
    return %c0_i32, %c0_i32_0 : i32, i32
  }
  func.func @transform_2(%arg0: i32) -> (i32, i32) {
    %c0_i32 = arith.constant 0 : i32
    %c0_i32_0 = arith.constant 0 : i32
    %c0_i32_1 = arith.constant 0 : i32
    return %c0_i32, %c0_i32_0 : i32, i32
  }
  func.func @transform_3(%arg0: i32) -> (i32, i32) {
    %c0_i32 = arith.constant 0 : i32
    %c0_i32_0 = arith.constant 0 : i32
    %c0_i32_1 = arith.constant 0 : i32
    return %c0_i32, %c0_i32_0 : i32, i32
  }
  func.func @transform_4(%arg0: i32) -> (i32, i32) {
    %c0_i32 = arith.constant 0 : i32
    %c0_i32_0 = arith.constant 0 : i32
    %c0_i32_1 = arith.constant 0 : i32
    return %c0_i32, %c0_i32_0 : i32, i32
  }
  func.func @transform_5(%arg0: i32) -> (i32, i32) {
    %c0_i32 = arith.constant 0 : i32
    %c0_i32_0 = arith.constant 0 : i32
    %c0_i32_1 = arith.constant 0 : i32
    return %c0_i32, %c0_i32_0 : i32, i32
  }
  func.func @transform_6(%arg0: i32) -> (i32, i32) {
    %c0_i32 = arith.constant 0 : i32
    %c0_i32_0 = arith.constant 0 : i32
    %c0_i32_1 = arith.constant 0 : i32
    return %c0_i32, %c0_i32_0 : i32, i32
  }
  func.func @transform_7(%arg0: i32) -> (i32, i32) {
    %c0_i32 = arith.constant 0 : i32
    %c0_i32_0 = arith.constant 0 : i32
    return %arg0, %c0_i32 : i32, i32
  }
}

</mosaic_0001>

<bundles_post_ra>
// kernel: mlp_out1_forward.1
= control target key start
LH: loop header
LB: loop body
LE: loop exit
PB: predicated region body
PF: predicated region fallthrough
CT: control target
= control target key end

     0   :  { %13 = vsyncpa [#allocation4], 0  ;;  %s560_s24 = smov [#allocation3]   ;;  %s671_s0 = inlined_call_operand.vmem [shape: f32[16,256], index: 0, kind: input, shape index: {}]   ;;  %s672_s1 = inlined_call_operand.hbm [shape: bf16[256,128], index: 1, kind: input, shape index: {}]   ;;  %s673_s2 = inlined_call_operand.vmem [shape: f32[1,128], index: 2, kind: input, shape index: {}]   ;;  %s674_s3 = inlined_call_operand.vmem [shape: bf16[128,128], index: 3, kind: input, shape index: {}]   ;;  %s675_s4 = inlined_call_operand.vmem [shape: f32[1,128], index: 4, kind: input, shape index: {}]   ;;  %s676_s5 = inlined_call_operand.vmem [shape: f32[8,128], index: 5, kind: input, shape index: {}]   ;;  %s677_s6 = inlined_call_operand.<no memory space> [shape: f32[1,1], index: 6, kind: input, shape index: {}]   ;;  %s678_s7 = inlined_call_operand.vmem [shape: f32[1,16], index: 7, kind: output, shape index: {}]  }
   0x1   :  { %s21_s25 = sshll.u32 %s560_s24, 4  ;;  %s22_s25 = int_to_ptr.vmem [resolvable:$true] %s21_s25 }
   0x2   :  { %s546_s26 = scalar_lea.vmem %s22_s25, 2048  ;;  %p551_p1 = scmp.lt.s32.totalorder %s22_s25, %s22_s25 }
   0x3   :  { %p547_p0 = scmp.ne.s32.totalorder %s22_s25, %s546_s26  ;;  %p552_p2 = scmp.lt.s32.totalorder %s546_s26, %s546_s26 }
   0x5   :  { %p553_p3 = por %p552_p2, %p551_p1 }
   0x7   :  { %p554_p4 = pnand %p553_p3, %p547_p0 }
   0x9   :  { %557 = shalt.err (!%p554_p4)
}
   0xa   :  { %s561_s27 = smov 64   ;;  %s562_s28 = smov 4  }
   0xb   :  { %27 = dma.hbm_to_vmem [thread:$0]  %s672_s1, 2048, %s22_s25, [#allocation4], %s561_s27, %s561_s27, %s562_s28  }
   0xc   :  { %558 = dma.done.wait [#allocation4], 2048  }
   0xd   :  { %559 = vsyncadd [#allocation4], 4294965248  ;;  %v563_v0 = vmov 0.0   ;;  %v514_v1 = vld [vmem:[#allocation3 + $0x78] sm:$0xff]   ;;  %v516_v3 = vld [vmem:[#allocation3 + $0x70] sm:$0xff]   ;;  %vm564_vm0 = vmmov 0   ;;  %v413_v53 = vstv %s677_s6 }
   0xe   :  { %482 = vmatprep.subr.bf16.mxu1 %v563_v0  ;;  %v515_v2 = vld [vmem:[#allocation3 + $0x38] sm:$0xff]   ;;  %448 = vmatprep.subr.bf16.mxu0 %v514_v1  ;;  %v517_v4 = vld [vmem:[#allocation3 + $0x30] sm:$0xff]   ;;  %v518_v5 = vld [vmem:[#allocation3 + $0x68] sm:$0xff]   ;;  %vm415_vm1 = vcmask 122880  }
   0xf   :  { %449 = vmatpush3.bf16.msra.mxu0 %v515_v2  ;;  %v519_v6 = vld [vmem:[#allocation3 + $0x28] sm:$0xff]   ;;  %v520_v7 = vld [vmem:[#allocation3 + $0x60] sm:$0xff]   ;;  %v522_v9 = vld [vmem:[#allocation3 + $0x58] sm:$0xff]   ;;  %498 = vmatprep.mubr.msk.bf16.mxu1 %vm564_vm0, %v563_v0 }
  0x10   :  { %450 = vmatprep.subr.bf16.mxu0 %v516_v3  ;;  %v521_v8 = vld [vmem:[#allocation3 + $0x20] sm:$0xff]   ;;  %v523_v10 = vld [vmem:[#allocation3 + $0x18] sm:$0xff]   ;;  %v524_v11 = vld [vmem:[#allocation3 + $0x50] sm:$0xff]  }
  0x11   :  { %v43_v12 = vld [vmem:[%s671_s0 + $0x8] sm:$0xff]  ;;  %v45_v13 = vld [vmem:[%s671_s0 + $0x18] sm:$0xff]  ;;  %v525_v14 = vld [vmem:[#allocation3 + $0x10] sm:$0xff]  }
  0x12   :  { %v47_v15 = vpack.c.bf16 %v45_v13, %v43_v12  ;;  %v530_v16 = vld [vmem:[%s674_s3 + $0x38] sm:$0xff]   ;;  %v526_v17 = vld [vmem:[#allocation3 + $0x48] sm:$0xff]   ;;  %v531_v18 = vld [vmem:[%s674_s3 + $0x30] sm:$0xff]  }
  0x13   :  { %451 = vmatpush3.bf16.msra.mxu0 %v517_v4  ;;  %483 = vmatpush3.bf16.msra.mxu1 %v530_v16  ;;  %v527_v19 = vld [vmem:[#allocation3 + $0x8] sm:$0xff]   ;;  %v528_v20 = vld [vmem:[#allocation3 + $0x40] sm:$0xff]   ;;  %v44_v24 = vld [vmem:[%s671_s0 + $0x10] sm:$0xff] }
  0x14   :  { %452 = vmatprep.subr.bf16.mxu0 %v518_v5  ;;  %215 = vmatprep.mubr.bf16.mxu0 %v47_v15  ;;  %v532_v21 = vld [vmem:[%s674_s3 + $0x28] sm:$0xff]   ;;  %v529_v22 = vld [vmem:[#allocation3] sm:$0xff]   ;;  %v534_v27 = vld [vmem:[%s674_s3 + $0x18] sm:$0xff]  }
  0x15   :  { %484 = vmatprep.subr.bf16.mxu1 %v563_v0  ;;  %v42_v23 = vld [vmem:[%s671_s0] sm:$0xff]  ;;  %v535_v28 = vld [vmem:[%s674_s3 + $0x10] sm:$0xff]   ;;  %v536_v29 = vld [vmem:[%s674_s3 + $0x8] sm:$0xff]  }
  0x16   :  { %v533_v25 = vld [vmem:[%s674_s3 + $0x20] sm:$0xff]   ;;  %v46_v26 = vpack.c.bf16 %v44_v24, %v42_v23 }
  0x17   :  { %453 = vmatpush3.bf16.msra.mxu0 %v519_v6  ;;  %485 = vmatpush3.bf16.msra.mxu1 %v531_v18  ;;  %v537_v30 = vld [vmem:[%s674_s3] sm:$0xff]  }
  0x18   :  { %454 = vmatprep.subr.bf16.mxu0 %v520_v7  ;;  %486 = vmatprep.subr.bf16.mxu1 %v563_v0  ;;  %v422_v34 = vld [vmem:[%s673_s2] ss:$0 sm:$0xff] }
  0x19   :  { %v439_v45 = vld [vmem:[%s675_s4] ss:$0 sm:$0xff] }
  0x1a   :  { %v341_v52 = vld [vmem:[%s676_s5] sm:$0xff] }
  0x1b   :  { %455 = vmatpush3.bf16.msra.mxu0 %v521_v8  ;;  %487 = vmatpush3.bf16.msra.mxu1 %v532_v21 }
  0x1c   :  { %456 = vmatprep.subr.bf16.mxu0 %v522_v9  ;;  %488 = vmatprep.subr.bf16.mxu1 %v563_v0 }
  0x1f   :  { %457 = vmatpush3.bf16.msra.mxu0 %v523_v10  ;;  %489 = vmatpush3.bf16.msra.mxu1 %v533_v25 }
  0x20   :  { %458 = vmatprep.subr.bf16.mxu0 %v524_v11  ;;  %490 = vmatprep.subr.bf16.mxu1 %v563_v0 }
  0x23   :  { %459 = vmatpush3.bf16.msra.mxu0 %v525_v14  ;;  %491 = vmatpush3.bf16.msra.mxu1 %v534_v27 }
  0x24   :  { %460 = vmatprep.subr.bf16.mxu0 %v526_v17  ;;  %492 = vmatprep.subr.bf16.mxu1 %v563_v0 }
  0x27   :  { %461 = vmatpush3.bf16.msra.mxu0 %v527_v19  ;;  %493 = vmatpush3.bf16.msra.mxu1 %v535_v28 }
  0x28   :  { %462 = vmatprep.subr.bf16.mxu0 %v528_v20  ;;  %494 = vmatprep.subr.bf16.mxu1 %v563_v0 }
  0x2b   :  { %463 = vmatpush3.bf16.msra.mxu0 %v529_v22  ;;  %495 = vmatpush3.bf16.msra.mxu1 %v536_v29 }
  0x2c   :  { %502 = vmatprep.subr.mxu0 %v563_v0  ;;  %496 = vmatprep.subr.bf16.mxu1 %v563_v0 }
  0x2e   :  { %216 = vmatmul.mubr.bf16.vlgmr.msra.gmra.mxu0 %v46_v26 }
  0x2f   :  { %497 = vmatpush3.bf16.msra.mxu1 %v537_v30  ;;  %506 = vmatprep.mubr.msk.f32.mxu0 %vm564_vm0, %v563_v0 }
  0xee   :  { %v464_v31 = vpop.f32.mrf.mxu0 }
  0xf0   :  { %v465_v32 = vpop.f32.mrf.mxu0 }
  0xf1   :  { %v466_v33 = vadd.f32 %v465_v32, %v464_v31 }
  0xf2   :  { %v467_v35 = vpop.f32.mrf.mxu0 }
  0xf3   :  { %v218_v37 = vadd.f32 %v466_v33, %v422_v34 }
  0xf4   :  { %v468_v36 = vpop.f32.mrf.mxu0 }
  0xf5   :  { %v469_v38 = vadd.f32 %v468_v36, %v467_v35  ;;  %v224_v40 = vmax.f32 %v218_v37, 0.0 }
  0xf7   :  { %v221_v39 = vadd.f32 %v469_v38, %v422_v34 }
  0xf9   :  { %v225_v41 = vmax.f32 %v221_v39, 0.0 }
  0xfb   :  { %v226_v42 = vpack.c.bf16 %v225_v41, %v224_v40 }
  0xfd   :  { %499 = vmatmul.mubr.bf16.vlgmr.msra.gmra.mxu1 %v226_v42 }
 0x1bd   :  { %v332_v43 = vpop.f32.mrf.mxu1 }
 0x1be   :  { %v333_v49 = vadd.f32 %v439_v45, %v332_v43 }
 0x1bf   :  { %v500_v44 = vpop.f32.mrf.mxu1 }
 0x1c0   :  { %v339_v51 = vmax.f32 %v333_v49, 0.0 }
 0x1c1   :  { %v335_v46 = vpop.f32.mrf.mxu1 }
 0x1c2   :  { %v336_v47 = vadd.f32 %v439_v45, %v335_v46 }
 0x1c3   :  { %v501_v48 = vpop.f32.mrf.mxu1 }
 0x1c4   :  { %v340_v50 = vmax.f32 %v336_v47, 0.0 }
 0x1c6   :  { %503 = vmatpush3.xpose.msra.mxu0 %v340_v50 }
 0x1c7   :  { %504 = vmatprep.subr.mxu0 %v563_v0 }
 0x1ca   :  { %505 = vmatpush3.xpose.msra.mxu0 %v339_v51 }
 0x1cd   :  { %507 = vmatmul.mubr.f32.vlgmr.msra.gmra.mxu0 %v341_v52 }
 0x28d   :  { %v408_v54 = vpop.f32.mrf.mxu0 }
 0x28e   :  { %v414_v55 = vadd.f32 %v413_v53, %v408_v54 }
 0x28f   :  { %v508_v56 = vpop.f32.mrf.mxu0 }
 0x290   :  { %416 = vst.msk [vmem:[%s678_s7] sm:$0x1] %vm415_vm1, %v414_v55 }
 0x291   :  { %421 = vsyncpa [#allocation4], 1 }

</bundles_post_ra>
